<compile_context>
chip_gen: v7x
topology: tpu7x:2x2x1
jax: 0.10.0
libtpu: 0.0.40
codegen_flags: <defaults>
</compile_context>

<pallas_src>
import jax
import jax.numpy as jnp
from jax import lax
from jax.experimental import pallas as pl
from jax.experimental.pallas import tpu as pltpu

_LANE = 128


def specaugment_kernel(tpos_ref, tlen_ref, fpos_ref, flen_ref, x_ref, o_ref):
    b = pl.program_id(0)
    t_blk = pl.program_id(1)
    n_freq, t_tile = x_ref.shape          # batch dim is squeezed: (F, T_TILE)
    t0 = t_blk * t_tile                   # global time offset of this tile

    tpos = tpos_ref[b]
    tlen = tlen_ref[b]
    fpos = fpos_ref[b]
    flen = flen_ref[b]

    # Global time index per lane of this tile; freq index per sublane.
    t_idx = t0 + lax.broadcasted_iota(jnp.int32, (1, t_tile), 1)   # (1, T_TILE)
    f_idx = lax.broadcasted_iota(jnp.int32, (n_freq, 1), 0)        # (F, 1)

    # pos <= i < pos + len   <=>   (i - pos) unsigned< len  (one compare/axis)
    time_mask = (t_idx - tpos).astype(jnp.uint32) < tlen.astype(jnp.uint32)
    freq_mask = (f_idx - fpos).astype(jnp.uint32) < flen.astype(jnp.uint32)
    mask = time_mask | freq_mask                                    # (F, T_TILE)

    x = x_ref[...]
    o_ref[...] = jnp.where(mask, jnp.zeros_like(x), x)


def _pick_time_tile(t_pad, n_freq, itemsize, vmem_budget=8 * 1024 * 1024):
    """Largest 128-multiple divisor of t_pad whose double-buffered in+out
    blocks (4 live copies) fit comfortably in scoped VMEM on every chip gen."""
    for cand in (2048, 1024, 512, 256, 128):
        if t_pad % cand == 0 and 4 * n_freq * cand * itemsize <= vmem_budget:
            return cand
    return _LANE


def spec_augment(x, key, freq_mask_width=(0, 8), time_mask_width=(0, 10)):
    """Apply time masking then frequency masking (SpecAugment.forward)."""
    B, F, T = x.shape
    k1, k2, k3, k4 = jax.random.split(key, 4)

    # torch.randint semantics: high is exclusive; mask_pos upper bound uses the
    # batch-wide max mask length (clamped to >= 1), as in the PyTorch module.
    tlen = jax.random.randint(k1, (B,), time_mask_width[0], time_mask_width[1],
                              dtype=jnp.int32)
    tpos = jax.random.randint(k2, (B,), 0,
                              jnp.maximum(1, T - jnp.max(tlen)), dtype=jnp.int32)
    flen = jax.random.randint(k3, (B,), freq_mask_width[0], freq_mask_width[1],
                              dtype=jnp.int32)
    fpos = jax.random.randint(k4, (B,), 0,
                              jnp.maximum(1, F - jnp.max(flen)), dtype=jnp.int32)

    itemsize = jnp.dtype(x.dtype).itemsize

    # Pad T up to a lane multiple so every output block is lane-dense (no-op
    # when T is already a multiple of 128, as in typical log-mel pipelines).
    t_pad = ((T + _LANE - 1) // _LANE) * _LANE
    t_tile = _pick_time_tile(t_pad, F, itemsize)
    x_in = x if t_pad == T else jnp.pad(x, ((0, 0), (0, 0), (0, t_pad - T)))

    grid = (B, t_pad // t_tile)
    block = (None, F, t_tile)          # batch dim squeezed -> kernel sees (F, T_TILE)
    index_map = lambda b, t, *prefetch: (b, 0, t)

    grid_spec = pltpu.PrefetchScalarGridSpec(
        num_scalar_prefetch=4,
        grid=grid,
        in_specs=[pl.BlockSpec(block, index_map)],
        out_specs=pl.BlockSpec(block, index_map),
    )

    out = pl.pallas_call(
        specaugment_kernel,
        out_shape=jax.ShapeDtypeStruct(x_in.shape, x_in.dtype),
        grid_spec=grid_spec,
        # x is input index 4 (after the 4 scalar-prefetch args); alias it to
        # the single output so no extra HBM output buffer is allocated.
        input_output_aliases={4: 0},
        compiler_params=pltpu.CompilerParams(
            dimension_semantics=("parallel", "parallel"),
            vmem_limit_bytes=32 * 1024 * 1024,
        ),
        cost_estimate=pl.CostEstimate(
            flops=0,
            transcendentals=0,
            bytes_accessed=2 * B * F * t_pad * itemsize,
        ),
    )(tpos, tlen, fpos, flen, x_in)

    if t_pad != T:
        out = out[:, :, :T]
    return out, (tpos, tlen, fpos, flen)


def _reference(x, tpos, tlen, fpos, flen):
    """Pure-JAX reference matching the PyTorch masking semantics."""
    B, F, T = x.shape
    t_idx = jnp.arange(T)[None, None, :]
    f_idx = jnp.arange(F)[None, :, None]
    tm = (tpos[:, None, None] <= t_idx) & (t_idx < (tpos + tlen)[:, None, None])
    fm = (fpos[:, None, None] <= f_idx) & (f_idx < (fpos + flen)[:, None, None])
    return jnp.where(tm | fm, 0.0, x)


if __name__ == "__main__":
    key = jax.random.PRNGKey(0)
    kx, krand = jax.random.split(key)

    B, F, T = 2, 16, 128  # small (batch, freq, time) consistent with (B, F, T)
    x = jax.random.normal(kx, (B, F, T), dtype=jnp.float32)

    out, (tpos, tlen, fpos, flen) = spec_augment(x, krand)
    out = jax.block_until_ready(out)

    ref = _reference(x, tpos, tlen, fpos, flen)
    assert out.shape == x.shape and out.dtype == x.dtype
    assert jnp.allclose(out, ref), "Pallas SpecAugment mismatch vs reference"

    print("KERNEL_OK")
</pallas_src>

<mosaic_0001>
module attributes {stable_mosaic.version = 11 : i64} {
  func.func @specaugment_kernel(%arg0: i32, %arg1: i32, %arg2: memref<2xi32, #tpu.memory_space<smem>>, %arg3: memref<2xi32, #tpu.memory_space<smem>>, %arg4: memref<2xi32, #tpu.memory_space<smem>>, %arg5: memref<2xi32, #tpu.memory_space<smem>>, %arg6: memref<1x16x128xf32, #tpu.memory_space<vmem>>, %arg7: memref<1x16x128xf32, #tpu.memory_space<vmem>>) attributes {dimension_semantics = [#tpu.dimension_semantics<parallel>, #tpu.dimension_semantics<parallel>], iteration_bounds = array<i64: 2, 1>, scalar_prefetch = 4 : i64, scratch_operands = 0 : i64, tpu.core_type = #tpu.core_type<tc>, window_params = [{transform_indices = @transform_0, window_bounds = array<i64: 1, 16, 128>}, {transform_indices = @transform_1, window_bounds = array<i64: 1, 16, 128>}]} {
    %c128_i32 = arith.constant 128 : i32
    %0 = arith.muli %arg1, %c128_i32 : i32
    %1 = arith.index_cast %arg0 : i32 to index
    %2 = memref.load %arg2[%1] : memref<2xi32, #tpu.memory_space<smem>>
    %3 = arith.index_cast %arg0 : i32 to index
    %4 = memref.load %arg3[%3] : memref<2xi32, #tpu.memory_space<smem>>
    %5 = arith.index_cast %arg0 : i32 to index
    %6 = memref.load %arg4[%5] : memref<2xi32, #tpu.memory_space<smem>>
    %7 = arith.index_cast %arg0 : i32 to index
    %8 = memref.load %arg5[%7] : memref<2xi32, #tpu.memory_space<smem>>
    %9 = tpu.iota {dimensions = array<i32: 1>} : vector<1x128xi32>
    %10 = vector.broadcast %0 : i32 to vector<1x128xi32>
    %11 = arith.addi %10, %9 : vector<1x128xi32>
    %12 = tpu.iota {dimensions = array<i32: 0>} : vector<16x1xi32>
    %13 = vector.broadcast %2 : i32 to vector<1x128xi32>
    %14 = arith.subi %11, %13 : vector<1x128xi32>
    %15 = vector.broadcast %4 : i32 to vector<1x128xi32>
    %16 = arith.cmpi ult, %14, %15 : vector<1x128xi32>
    %17 = vector.broadcast %6 : i32 to vector<16x1xi32>
    %18 = arith.subi %12, %17 : vector<16x1xi32>
    %19 = vector.broadcast %8 : i32 to vector<16x1xi32>
    %20 = arith.cmpi ult, %18, %19 : vector<16x1xi32>
    %21 = vector.broadcast %16 : vector<1x128xi1> to vector<16x128xi1>
    %22 = vector.broadcast %20 : vector<16x1xi1> to vector<16x128xi1>
    %23 = arith.ori %21, %22 : vector<16x128xi1>
    %c0 = arith.constant 0 : index
    %c0_0 = arith.constant 0 : index
    %c0_1 = arith.constant 0 : index
    %24 = vector.load %arg6[%c0, %c0_0, %c0_1] : memref<1x16x128xf32, #tpu.memory_space<vmem>>, vector<1x16x128xf32>
    %25 = vector.shape_cast %24 : vector<1x16x128xf32> to vector<16x128xf32>
    %cst = arith.constant 0.000000e+00 : f32
    %26 = vector.broadcast %cst : f32 to vector<16x128xf32>
    %27 = arith.select %23, %26, %25 : vector<16x128xi1>, vector<16x128xf32>
    %c0_2 = arith.constant 0 : index
    %c0_3 = arith.constant 0 : index
    %c0_4 = arith.constant 0 : index
    %28 = vector.load %arg7[%c0_2, %c0_3, %c0_4] : memref<1x16x128xf32, #tpu.memory_space<vmem>>, vector<1x16x128xf32>
    %29 = vector.shape_cast %28 : vector<1x16x128xf32> to vector<16x128xf32>
    %30 = vector.shape_cast %27 : vector<16x128xf32> to vector<1x16x128xf32>
    tpu.vector_store %arg7[%c0_2, %c0_3, %c0_4], %30 {strides = array<i32>} : memref<1x16x128xf32, #tpu.memory_space<vmem>>, vector<1x16x128xf32>,
    return
  }
  func.func @transform_0(%arg0: i32, %arg1: i32, %arg2: memref<2xi32, #tpu.memory_space<smem>>, %arg3: memref<2xi32, #tpu.memory_space<smem>>, %arg4: memref<2xi32, #tpu.memory_space<smem>>, %arg5: memref<2xi32, #tpu.memory_space<smem>>) -> (i32, i32, i32) {
    %c0_i32 = arith.constant 0 : i32
    %c0_i32_0 = arith.constant 0 : i32
    return %arg0, %c0_i32, %arg1 : i32, i32, i32
  }
  func.func @transform_1(%arg0: i32, %arg1: i32, %arg2: memref<2xi32, #tpu.memory_space<smem>>, %arg3: memref<2xi32, #tpu.memory_space<smem>>, %arg4: memref<2xi32, #tpu.memory_space<smem>>, %arg5: memref<2xi32, #tpu.memory_space<smem>>) -> (i32, i32, i32) {
    %c0_i32 = arith.constant 0 : i32
    %c0_i32_0 = arith.constant 0 : i32
    return %arg0, %c0_i32, %arg1 : i32, i32, i32
  }
}

</mosaic_0001>

<bundles_post_ra>
// kernel: tpu_custom_call.1
= control target key start
LH: loop header
LB: loop body
LE: loop exit
PB: predicated region body
PF: predicated region fallthrough
CT: control target
= control target key end

     0   :  { %s792_s0 = inlined_call_operand.vmem [shape: s32[2], index: 0, kind: input, shape index: {}]   ;;  %s793_s4 = inlined_call_operand.hbm [shape: f32[2,16,128], index: 4, kind: input, shape index: {}, may-alias: {4,5}]   ;;  %s794_s5 = inlined_call_operand.hbm [shape: f32[2,16,128], index: 5, kind: output, shape index: {}, may-alias: {4,5}]   ;;  %s795_s1 = inlined_call_operand.vmem [shape: s32[2], index: 1, kind: input, shape index: {}]   ;;  %s796_s2 = inlined_call_operand.vmem [shape: s32[2], index: 2, kind: input, shape index: {}]   ;;  %s797_s3 = inlined_call_operand.vmem [shape: s32[2], index: 3, kind: input, shape index: {}]  }
   0x1   :  { %s10_s20 = sshll.u32 %s792_s0, 4  ;;  %s14_s23 = sshll.u32 %s795_s1, 4  ;;  %s11_s20 = int_to_ptr.vmem [resolvable:$true] %s10_s20  ;;  %s15_s23 = int_to_ptr.vmem [resolvable:$true] %s14_s23 }
   0x2   :  { %s397_s24 = scalar_lea.vmem %s11_s20, 16  ;;  %p402_p1 = scmp.lt.s32.totalorder %s11_s20, %s11_s20 }
   0x3   :  { %p398_p0 = scmp.ne.s32.totalorder %s11_s20, %s397_s24  ;;  %p403_p2 = scmp.lt.s32.totalorder %s397_s24, %s397_s24 }
   0x5   :  { %p404_p3 = por %p403_p2, %p402_p1 }
   0x7   :  { %p405_p4 = pnand %p404_p3, %p398_p0 }
   0x9   :  { %408 = shalt.err (!%p405_p4)  }
   0xa   :  { %s561_s25 = smov [#allocation3]   ;;  %s409_s26 = scalar_lea.vmem %s15_s23, 16 }
   0xb   :  { %13 = dma.vmem_to_smem %s11_s20, 16, %s561_s25, [#allocation2] }
   0xc   :  { %p410_p5 = scmp.ne.s32.totalorder %s15_s23, %s409_s26  ;;  %p414_p6 = scmp.lt.s32.totalorder %s15_s23, %s15_s23 }
   0xd   :  { %p415_p7 = scmp.lt.s32.totalorder %s409_s26, %s409_s26 }
   0xf   :  { %p416_p8 = por %p415_p7, %p414_p6 }
  0x11   :  { %p417_p9 = pnand %p416_p8, %p410_p5 }
  0x13   :  { %420 = shalt.err (!%p417_p9)  }
  0x14   :  { %s562_s0 = smov [#allocation4]   ;;  %s18_s28 = sshll.u32 %s796_s2, 4  ;;  %s19_s28 = int_to_ptr.vmem [resolvable:$true] %s18_s28 }
  0x15   :  { %17 = dma.vmem_to_smem %s15_s23, 16, %s562_s0, [#allocation2] }
  0x16   :  { %s22_s6 = sshll.u32 %s797_s3, 4  ;;  %s421_s7 = scalar_lea.vmem %s19_s28, 16  ;;  %s23_s6 = int_to_ptr.vmem [resolvable:$true] %s22_s6 }
  0x17   :  { %p422_p10 = scmp.ne.s32.totalorder %s19_s28, %s421_s7  ;;  %p426_p11 = scmp.lt.s32.totalorder %s19_s28, %s19_s28 }
  0x18   :  { %p427_p12 = scmp.lt.s32.totalorder %s421_s7, %s421_s7 }
  0x1a   :  { %p428_p13 = por %p427_p12, %p426_p11 }
  0x1c   :  { %p429_p0 = pnand %p428_p13, %p422_p10 }
  0x1e   :  { %432 = shalt.err (!%p429_p0)  }
  0x1f   :  { %s563_s8 = smov [#allocation5]   ;;  %s433_s9 = scalar_lea.vmem %s23_s6, 16 }
  0x20   :  { %21 = dma.vmem_to_smem %s19_s28, 16, %s563_s8, [#allocation2] }
  0x21   :  { %p434_p1 = scmp.ne.s32.totalorder %s23_s6, %s433_s9  ;;  %p438_p2 = scmp.lt.s32.totalorder %s23_s6, %s23_s6 }
  0x22   :  { %p439_p3 = scmp.lt.s32.totalorder %s433_s9, %s433_s9 }
  0x24   :  { %p440_p4 = por %p439_p3, %p438_p2 }
  0x26   :  { %p441_p5 = pnand %p440_p4, %p434_p1 }
  0x28   :  { %444 = shalt.err (!%p441_p5)  }
  0x29   :  { %s564_s2 = smov [#allocation6]  }
  0x2a   :  { %25 = dma.vmem_to_smem %s23_s6, 16, %s564_s2, [#allocation2] }
  0x2b   :  { %527 = dma.done.wait [#allocation2], 64 }
  0x2c   :  { %528 = vsyncadd [#allocation2], 4294967232 }
  0x2d   :  { %27 = sfence }
  0x2e   :  { %28 = vsyncpa [#allocation8], 0 }
  0x2f   :  { %30 = vsyncpa [#allocation8 + $0x1], 0 }
  0x30   :  { %31 = vsyncpa [#allocation9], 0 }
  0x31   :  { %33 = vsyncpa [#allocation9 + $0x1], 0  ;;  %s613_s3 = smov 0   ;;  %s615_s10 = smov 0  }
  0x32   :  { %s617_s11 = smov 0   ;;  %s619_s12 = smov 0  }
  0x33   :  { %s621_s13 = smov 0   ;;  %s623_s14 = smov 0  }
  0x34 LB: > { %s310_s15 = sadd.s32 4294967295, %s559_s14   ;;  %s311_s16 = sadd.s32 4294967294, %s559_s14   ;;  %s559_s14 = sphi %s623_s14, %s39_s14   ;;  %s555_s13 = sphi %s621_s13, %s812_s13   ;;  %s551_s12 = sphi %s619_s12, %s811_s12   ;;  %s547_s11 = sphi %s617_s11, %s810_s11   ;;  %s543_s10 = sphi %s615_s10, %s809_s10   ;;  %s539_s3 = sphi %s613_s3, %s808_s3  }
  0x35   : > { %s51_s17 = sadd.s32 1, %s555_s13  ;;  %s60_s18 = sadd.s32 1, %s547_s11 }
  0x36   : > { %p53_p6 = scmp.ge.s32.totalorder %s51_s17, 2  ;;  %p67_p7 = scmp.ne.s32.totalorder %s547_s11, %s543_s10 }
  0x37   : > { %p68_p8 = scmp.eq.s32.totalorder %s559_s14, 0  ;;  %p73_p9 = scmp.ne.s32.totalorder %s543_s10, %s539_s3 }
  0x38   : > { %s814_s17 = smov (%p53_p6, %s51_s17), 0  ;;  %p74_p11 = scmp.eq.s32.totalorder %s310_s15, 0 }
  0x39   : > { %p654_p10 = por %p68_p8, %p67_p7  ;;  %s55_s20 = ssub.s32 %s555_s13, %s814_s17 }
  0x3a   : > { %p99_p12 = scmp.eq.s32.totalorder %s310_s15, 1  ;;  %p58_p13 = scmp.eq.s32.totalorder %s55_s20, 0 }
  0x3b   : > { %p660_p0 = por %p74_p11, %p73_p9  ;;  %p105_p2 = scmp.eq.s32.totalorder %s311_s16, 1 }
  0x3c   : > { %p664_p1 = por %p99_p12, %p67_p7  ;;  %p339_p5 = scmp.lt.s32.totalorder %s559_s14, 2 }
  0x3d   : > { %s669_s23 = scalar_select %p58_p13, %s547_s11, %s60_s18  }
  0x3e   : > { %s801_s22 = scalar_select %p664_p1, 1, 0 }
  0x3f   : > { %p671_p3 = por %p105_p2, %p73_p9  ;;  %s125_s25 = sand.u32 1, %s547_s11  }
  0x40   : > { %s314_s26 = sshll.u32 %s125_s25, 4  ;;  %s325_s0 = sshll.u32 %s555_s13, 8 }
  0x41   : > { %s802_s24 = scalar_select %p671_p3, 1, 0 }
  0x42   : > { %s682_s28 = scalar_lea.hbm %s793_s4, %s325_s0  ;;  %s129_s29 = scalar_lea.vmem [#allocation7], %s314_s26 }
  0x43   : > { %s137_s30 = sshll.u32 %s129_s29, 4  ;;  %p688_p6 = pnand %p339_p5, %p654_p10  ;;  %s684_s30 = int_to_ptr.vmem [resolvable:$true] %s137_s30 }
  0x44   : > { %s693_s7 = scalar_lea.sflag [#allocation8], %s125_s25  ;;  %s445_s8 = scalar_lea.hbm %s682_s28, 256 }
  0x45   : > { %p446_p8 = scmp.ne.s32.totalorder %s682_s28, %s445_s8  ;;  %p447_p9 = pneg %p688_p6 }
  0x46   : > { %s450_s15 = scalar_lea.hbm %s793_s4, 512  ;;  %p451_p10 = scmp.lt.u32.totalorder %s682_s28, %s793_s4 }
  0x47   : > { %p448_p11 = pnand %p447_p9, %p446_p8  ;;  %p452_p13 = scmp.lt.u32.totalorder %s450_s15, %s445_s8 }
  0x48   : > { %p454_p5 = scmp.lt.u32.totalorder %s445_s8, %s682_s28 }
  0x49   : > { %p449_p12 = pneg %p448_p11  ;;  %p453_p2 = por %p452_p13, %p451_p10 }
  0x4b   : > { %p455_p4 = por %p454_p5, %p453_p2 }
  0x4d   : > { %p456_p7 = pnand %p455_p4, %p449_p12 }
  0x4f   : > { %459 = shalt.err (!%p456_p7)
}
  0x50   : > { %s460_s19 = scalar_lea.vmem %s684_s30, 256  ;;  %s565_s20 = smov [#allocation7]  }
  0x51   : > { %p461_p8 = scmp.ne.s32.totalorder %s684_s30, %s460_s19  ;;  %s465_s25 = sshll.u32 %s565_s20, 4  ;;  %s466_s25 = int_to_ptr.vmem [resolvable:$false] %s465_s25 }
  0x52   : > { %s467_s26 = scalar_lea.vmem %s466_s25, 512  ;;  %p468_p1 = scmp.lt.s32.totalorder %s684_s30, %s466_s25 }
  0x53   : > { %p463_p11 = pnand %p461_p8, %p447_p9  ;;  %p469_p10 = scmp.lt.s32.totalorder %s467_s26, %s460_s19 }
  0x55   : > { %p464_p3 = pneg %p463_p11  ;;  %p470_p13 = por %p469_p10, %p468_p1 }
  0x57   : > { %p471_p2 = pnand %p470_p13, %p464_p3 }
  0x59   : > { %474 = shalt.err (!%p471_p2)
}
  0x5a   : > { %s566_s0 = smov 128   ;;  %s567_s1 = smov 8  }
  0x5b   : > { %334 = dma.hbm_to_vmem [thread:$0]  (!%p688_p6), %s682_s28, 256, %s684_s30, %s693_s7, %s566_s0, %s566_s0, %s567_s1  }
  0x5c   : > { %p145_p4 = scmp.lt.s32.totalorder %s559_s14, 3  ;;  %p804_p7 = scmp.ge.s32.totalorder %s559_s14, 1 }
  0x5e   : > { %p146_p9 = pnand %p804_p7, %p145_p4 }
  0x5f   : > { %s725_s27 = sand.u32 (!%p146_p9), 1, %s543_s10  }
  0x60   : > { %149 = sbr.rel (%p146_p9) target bundleno = 134 (0x86), region = 24  ;;  %s318_s29 = sshll.u32 (!%p146_p9), %s725_s27, 4 }
  0x61   : > { %s152_s8 = scalar_lea.sflag (!%p146_p9), [#allocation8], %s725_s27  ;;  %s155_s9 = scalar_lea.vmem (!%p146_p9), [#allocation7], %s318_s29 }
  0x67   : > { %530 = dma.done.wait (%p660_p0), %s152_s8, 256  }
  0x68   : > { %532 = vsyncadd (%p660_p0), %s152_s8, 4294967040  ;;  %v179_v0 = vlaneseq  ;;  %s175_s28 = sld [smem:[#allocation3 + %s551_s12]]  ;;  %s173_s21 = scalar_lea.vmem [#allocation10], %s318_s29  ;;  %v204_v11 = vld [vmem:[%s155_s9] sm:$0xff]  ;;  %v205_v12 = vld [vmem:[%s155_s9 + $0x8] sm:$0xff] }
  0x69   : > { %s176_s30 = sld [smem:[#allocation4 + %s551_s12]]  ;;  %s225_s2 = sshll.u32 %s173_s21, 4  ;;  %s738_s2 = int_to_ptr.vmem [resolvable:$true] %s225_s2 }
  0x6a   : > { %s177_s6 = sld [smem:[#allocation5 + %s551_s12]]  ;;  %v184_v1 = vshrl.u32 %v179_v0, 7  ;;  %v180_v2 = vand.u32 127, %v179_v0  ;;  %s326_s15 = sshll.u32 %s551_s12, 8 }
  0x6b   : > { %s178_s7 = sld [smem:[#allocation6 + %s551_s12]]  ;;  %s743_s19 = scalar_lea.hbm %s794_s5, %s326_s15 }
  0x6c   : > { %v185_v3 = vadd.s32 8, %v184_v1  ;;  %s211_s12 = scalar_lea.sflag [#allocation9], %s725_s27  ;;  %s475_s20 = scalar_lea.vmem %s738_s2, 256 }
  0x6d   : > { %p476_p0 = scmp.ne.s32.totalorder %s738_s2, %s475_s20  ;;  %p805_p1 = scmp.ne.s32.totalorder %s801_s22, 0 }
  0x6e   : > { %v186_v4 = vstv %s175_s28  ;;  %s568_s25 = smov [#allocation10]  }
  0x6f   : > { %v188_v5 = vstv %s176_s30  ;;  %v187_v6 = vsub.s32 %v180_v2, %v186_v4  ;;  %p477_p3 = pnand %p476_p0, %p805_p1  ;;  %s479_s26 = sshll.u32 %s568_s25, 4  ;;  %s480_s26 = int_to_ptr.vmem [resolvable:$false] %s479_s26 }
  0x70   : > { %v190_v7 = vstv %s177_s6  ;;  %s481_s0 = scalar_lea.vmem %s480_s26, 512  ;;  %p482_p12 = scmp.lt.s32.totalorder %s738_s2, %s480_s26 }
  0x71   : > { %v193_v8 = vstv %s178_s7  ;;  %v191_v9 = vsub.s32 %v184_v1, %v190_v7  ;;  %v192_v10 = vsub.s32 %v185_v3, %v190_v7  ;;  %vm189_vm0 = vcmp.lt.u32.totalorder %v187_v6, %v188_v5  ;;  %p478_p6 = pneg %p477_p3  ;;  %p483_p5 = scmp.lt.s32.totalorder %s481_s0, %s475_s20 }
  0x73   : > { %vm194_vm1 = vcmp.lt.u32.totalorder %v191_v9, %v193_v8  ;;  %vm195_vm2 = vcmp.lt.u32.totalorder %v192_v10, %v193_v8  ;;  %p484_p8 = por %p483_p5, %p482_p12 }
  0x74   : > { %vm202_vm3 = vmor %vm189_vm0, %vm194_vm1 }
  0x75   : > { %v206_v13 = vsel %vm202_vm3, 0.0, %v204_v11  ;;  %vm203_vm4 = vmor %vm189_vm0, %vm195_vm2  ;;  %p485_p11 = pnand %p484_p8, %p478_p6 }
  0x76   : > { %208 = vst [vmem:[%s173_s21] sm:$0xff] %v206_v13  ;;  %v207_v14 = vsel %vm203_vm4, 0.0, %v205_v12 }
  0x77   : > { %209 = vst [vmem:[%s173_s21 + $0x8] sm:$0xff] %v207_v14 }
  0x78   : > { %488 = shalt.err (!%p485_p11)
}
  0x79   : > { %s489_s1 = scalar_lea.hbm %s743_s19, 256  ;;  %s493_s9 = scalar_lea.hbm %s794_s5, 512 }
  0x7a   : > { %p490_p10 = scmp.ne.s32.totalorder %s743_s19, %s489_s1  ;;  %p494_p4 = scmp.lt.u32.totalorder %s743_s19, %s794_s5 }
  0x7b   : > { %p495_p7 = scmp.lt.u32.totalorder %s493_s9, %s489_s1  ;;  %p497_p0 = scmp.lt.u32.totalorder %s489_s1, %s743_s19 }
  0x7c   : > { %p491_p13 = pnand %p490_p10, %p805_p1 }
  0x7d   : > { %p496_p9 = por %p495_p7, %p494_p4 }
  0x7e   : > { %p492_p2 = pneg %p491_p13 }
  0x7f   : > { %p498_p3 = por %p497_p0, %p496_p9 }
  0x81   : > { %p499_p6 = pnand %p498_p3, %p492_p2 }
  0x83   : > { %502 = shalt.err (!%p499_p6)
}
  0x84   : > { %s569_s6 = smov 128   ;;  %s570_s7 = smov 8  }
  0x85   : > { %329 = dma.vmem_to_hbm [thread:$0]  (%p805_p1), %s738_s2, 256, %s743_s19, %s211_s12, %s569_s6, %s569_s6, %s570_s7  }
  0x86 PF: > { %s240_s21 = sand.u32 1, %s539_s3   ;;  %p806_p12 = scmp.ne.s32.totalorder %s802_s24, 0 }
  0x87   : > { %p807_p5 = scmp.ge.s32.totalorder %s559_s14, 2  ;;  %s241_s15 = scalar_lea.sflag [#allocation9], %s240_s21 }
  0x89   : > { %p336_p8 = pnand %p807_p5, %p806_p12 }
  0x8b   : > { %534 = dma.done.wait (!%p336_p8), %s241_s15, 256  }
  0x8c   : > { %536 = vsyncadd (!%p336_p8), %s241_s15, 4294967040  ;;  %s39_s14 = sadd.s32 1, %s559_s14   ;;  %s808_s3 = smov %s543_s10 }
  0x8d   : > { %p36_p11 = scmp.ge.s32.totalorder %s39_s14, 4   ;;  %s809_s10 = smov %s547_s11 }
  0x8e   : > { %s810_s11 = smov %s669_s23  ;;  %s811_s12 = smov %s555_s13 }
  0x8f   : > { %s812_s13 = smov %s814_s17  ;;  %38 = sbr.rel (!%p36_p11) target bundleno = 52 (0x34), region = 69 }
  0x96   :  { %246 = vsyncpa [#allocation8], 1 }
  0x97   :  { %248 = vsyncpa [#allocation8 + $0x1], 1 }
  0x98   :  { %249 = vsyncpa [#allocation9], 1 }
  0x99   :  { %251 = vsyncpa [#allocation9 + $0x1], 1 }

</bundles_post_ra>
